<compile_context>
chip_gen: v7x
topology: tpu7x:2x2x1
jax: 0.10.0
libtpu: 0.0.40
codegen_flags: <defaults>
</compile_context>

<pallas_src>
import math

import jax
import jax.numpy as jnp
from jax.experimental import pallas as pl
from jax.experimental.pallas import tpu as pltpu

_MiB = 1024 * 1024


# ---------------------------------------------------------------------------
# Kernels
# ---------------------------------------------------------------------------
def _mlp_single_kernel(x_ref, g_ref, u_ref, d_ref, o_ref):
    """Weights fully resident along I (nI == 1): single shot, no accumulator."""
    x = x_ref[...]                                                    # (tT, H)
    gate = jnp.dot(x, g_ref[...], preferred_element_type=jnp.float32)  # (tT, I)
    up = jnp.dot(x, u_ref[...], preferred_element_type=jnp.float32)    # (tT, I)
    hidden = (gate * jax.nn.sigmoid(gate)) * up                       # SiLU(gate)*up
    o_ref[...] = jnp.dot(hidden.astype(d_ref.dtype), d_ref[...],
                         preferred_element_type=jnp.float32).astype(o_ref.dtype)


def _mlp_reduce_kernel(x_ref, g_ref, u_ref, d_ref, o_ref, acc_ref):
    """I streamed in tiles (last, 'arbitrary' grid axis) with an f32 accumulator."""
    i = pl.program_id(2)

    x = x_ref[...]                                                    # (tT, H)
    gate = jnp.dot(x, g_ref[...], preferred_element_type=jnp.float32)  # (tT, tI)
    up = jnp.dot(x, u_ref[...], preferred_element_type=jnp.float32)    # (tT, tI)
    hidden = (gate * jax.nn.sigmoid(gate)) * up
    partial = jnp.dot(hidden.astype(d_ref.dtype), d_ref[...],
                      preferred_element_type=jnp.float32)             # (tT, H) f32

    @pl.when(i == 0)
    def _first():
        acc_ref[...] = partial          # write directly, no zero-then-+=

    @pl.when(i > 0)
    def _accum():
        acc_ref[...] += partial

    @pl.when(i == pl.num_programs(2) - 1)
    def _finalize():
        o_ref[...] = acc_ref[...].astype(o_ref.dtype)


# ---------------------------------------------------------------------------
# Tiling / VMEM budgeting
# ---------------------------------------------------------------------------
def _round_up(v, m):
    return (v + m - 1) // m * m


def _vmem_capacity_bytes():
    try:
        cap = getattr(pltpu.get_tpu_info(), "vmem_capacity_bytes", None)
        if cap:
            return int(cap)
    except Exception:
        pass
    return 64 * _MiB  # conservative (v7x-sized) fallback


def _footprint_bytes(tT, tI, H, x_it, w_it, out_it, with_acc):
    fp = (2 * tT * H * x_it        # x tile (double-buffered)
          + 2 * tT * H * out_it    # out tile
          + 2 * H * tI * w_it      # gate tile
          + 2 * H * tI * w_it      # up tile
          + 2 * tI * H * w_it)     # down tile
    if with_acc:
        fp += tT * H * 4           # f32 accumulator scratch
    return fp


def _pick_tiles(T, H, I, x_it, w_it, out_it, budget):
    """Largest MXU/lane-friendly (tT, tI) that fits the VMEM budget."""
    T8 = _round_up(max(T, 1), 8)
    if T8 <= 128:
        tT_cands = [T8]
    else:
        # On 64 MiB parts (v7x) with large H, cap the token tile at 256.
        big = 256 if (budget <= 56 * _MiB and H >= 4096) else 512
        tT_cands = sorted({c for c in (big, 256, 128) if c <= T8}, reverse=True) or [128]

    if I <= 256:
        tI_cands = [I]                       # resident; also covers I < 128
    else:
        # Prefer resident weights, then 512/256; floor at 128 (never 64).
        tI_cands = [I] + [c for c in (512, 256, 128) if c < I and I % c == 0]

    for tT in tT_cands:                      # maximize tT first (cuts weight restream)
        for tI in tI_cands:                  # then prefer resident / large tI
            if _footprint_bytes(tT, tI, H, x_it, w_it, out_it, tI < I) <= budget:
                return tT, tI
    # Nothing fits the soft budget: take the smallest tiles and raise vmem_limit.
    return tT_cands[-1], tI_cands[-1]


# ---------------------------------------------------------------------------
# Wrapper
# ---------------------------------------------------------------------------
def fused_sigma_mlp(x, gate_proj, up_proj, down_proj, *, compute_dtype=None):
    """x: (E, T, H); gate/up: (E, H, I); down: (E, I, H) -> (E, T, H).

    compute_dtype: optional MXU dtype (e.g. jnp.bfloat16). Accumulation stays f32,
    output keeps the original x dtype.
    """
    E, T, H = x.shape
    _, _, I = gate_proj.shape
    out_dtype = x.dtype

    if compute_dtype is not None:
        x = x.astype(compute_dtype)
        gate_proj = gate_proj.astype(compute_dtype)
        up_proj = up_proj.astype(compute_dtype)
        down_proj = down_proj.astype(compute_dtype)

    x_it = jnp.dtype(x.dtype).itemsize
    w_it = jnp.dtype(gate_proj.dtype).itemsize
    out_it = jnp.dtype(out_dtype).itemsize

    vmem_cap = _vmem_capacity_bytes()
    # ~8 MiB headroom on 64 MiB parts; cap at ~100 MiB on 128 MiB parts.
    budget = min(vmem_cap - 8 * _MiB, 100 * _MiB)

    tT, tI = _pick_tiles(T, H, I, x_it, w_it, out_it, budget)

    # Pad tokens so tT divides T (padded rows are zeros -> zero outputs, sliced off).
    T_pad = _round_up(T, tT)
    if T_pad != T:
        x = jnp.pad(x, ((0, 0), (0, T_pad - T), (0, 0)))
    nT = T_pad // tT
    nI = I // tI if I % tI == 0 else 1       # tI either divides I or equals I

    # Advisory cost estimate; weights are re-streamed once per token tile.
    cost = pl.CostEstimate(
        flops=6 * E * T_pad * H * I,
        transcendentals=E * T_pad * I,
        bytes_accessed=(E * T_pad * H * x_it                 # x (resident across I)
                        + E * nT * 2 * H * I * w_it          # gate + up
                        + E * nT * I * H * w_it              # down
                        + E * T_pad * H * out_it),           # out
    )

    fp = _footprint_bytes(tT, tI, H, x_it, w_it, out_it, nI > 1)
    vmem_limit = int(min(max(fp + 4 * _MiB, 32 * _MiB), vmem_cap - 4 * _MiB))

    if nI == 1:
        # Fast path: per-expert weights fully resident; no reduction axis, no acc RMW.
        grid = (E, nT)
        in_specs = [
            pl.BlockSpec((pl.Squeezed(), tT, H), lambda e, t: (e, t, 0)),
            pl.BlockSpec((pl.Squeezed(), H, I), lambda e, t: (e, 0, 0)),
            pl.BlockSpec((pl.Squeezed(), H, I), lambda e, t: (e, 0, 0)),
            pl.BlockSpec((pl.Squeezed(), I, H), lambda e, t: (e, 0, 0)),
        ]
        out_spec = pl.BlockSpec((pl.Squeezed(), tT, H), lambda e, t: (e, t, 0))
        kernel = _mlp_single_kernel
        scratch = []
        dims = ("parallel", "parallel")          # E leads: megacore splits on experts
    else:
        grid = (E, nT, nI)                       # I last: reduction axis
        in_specs = [
            # x tile: independent of i -> resident in VMEM across the I loop.
            pl.BlockSpec((pl.Squeezed(), tT, H), lambda e, t, i: (e, t, 0)),
            # gate / up / down weight tiles streamed along I.
            pl.BlockSpec((pl.Squeezed(), H, tI), lambda e, t, i: (e, 0, i)),
            pl.BlockSpec((pl.Squeezed(), H, tI), lambda e, t, i: (e, 0, i)),
            pl.BlockSpec((pl.Squeezed(), tI, H), lambda e, t, i: (e, i, 0)),
        ]
        out_spec = pl.BlockSpec((pl.Squeezed(), tT, H), lambda e, t, i: (e, t, 0))
        kernel = _mlp_reduce_kernel
        scratch = [pltpu.VMEM((tT, H), jnp.float32)]
        dims = ("parallel", "parallel", "arbitrary")

    out = pl.pallas_call(
        kernel,
        out_shape=jax.ShapeDtypeStruct((E, T_pad, H), out_dtype),
        grid_spec=pltpu.PrefetchScalarGridSpec(
            num_scalar_prefetch=0,
            grid=grid,
            in_specs=in_specs,
            out_specs=out_spec,
            scratch_shapes=scratch,
        ),
        compiler_params=pltpu.CompilerParams(
            dimension_semantics=dims,
            vmem_limit_bytes=vmem_limit,
        ),
        cost_estimate=cost,
    )(x, gate_proj, up_proj, down_proj)

    if T_pad != T:
        out = out[:, :T, :]
    return out


# ---------------------------------------------------------------------------
# Harness
# ---------------------------------------------------------------------------
def _kaiming_uniform_like(key, shape, fan_in):
    # torch.nn.init.kaiming_uniform_(w, a=sqrt(5)) applied directly to the (H,I)/(I,H)
    # per-expert matrices -> U(-1/sqrt(fan_in), 1/sqrt(fan_in)) with fan_in = size(1).
    bound = 1.0 / math.sqrt(fan_in)
    return jax.random.uniform(key, shape, jnp.float32, minval=-bound, maxval=bound)


def _reference(x, gate_proj, up_proj, down_proj):
    gate = jnp.einsum("eth,ehi->eti", x, gate_proj)
    up = jnp.einsum("eth,ehi->eti", x, up_proj)
    hidden = jax.nn.silu(gate) * up
    return jnp.einsum("eti,eih->eth", hidden, down_proj)


if __name__ == "__main__":
    # Small, module-consistent shapes.
    E = 4    # n_routed_experts
    T = 8    # tokens per expert
    H = 32   # hidden_size
    I = 64   # intermediate_size

    key = jax.random.PRNGKey(0)
    kx, kg, ku, kd = jax.random.split(key, 4)

    x = jax.random.normal(kx, (E, T, H), jnp.float32)
    gate_proj = _kaiming_uniform_like(kg, (E, H, I), fan_in=I)
    up_proj = _kaiming_uniform_like(ku, (E, H, I), fan_in=I)
    down_proj = _kaiming_uniform_like(kd, (E, I, H), fan_in=H)

    ref = _reference(x, gate_proj, up_proj, down_proj)

    # f32 path: tight tolerance vs reference.
    out = jax.block_until_ready(fused_sigma_mlp(x, gate_proj, up_proj, down_proj))
    assert out.shape == (E, T, H)
    assert jnp.allclose(out, ref, atol=1e-5, rtol=1e-5), "f32 mismatch vs reference"

    # bf16 MXU path (f32 accumulation): loose tolerance.
    out_bf16 = jax.block_until_ready(
        fused_sigma_mlp(x, gate_proj, up_proj, down_proj, compute_dtype=jnp.bfloat16))
    assert out_bf16.shape == (E, T, H)
    assert jnp.allclose(out_bf16, ref, atol=5e-2, rtol=5e-2), "bf16 mismatch vs reference"

    print("KERNEL_OK")
</pallas_src>

<mosaic_0001>
module attributes {stable_mosaic.version = 11 : i64} {
  func.func @_mlp_single_kernel(%arg0: i32, %arg1: i32, %arg2: memref<1x8x32xf32, #tpu.memory_space<vmem>>, %arg3: memref<1x32x64xf32, #tpu.memory_space<vmem>>, %arg4: memref<1x32x64xf32, #tpu.memory_space<vmem>>, %arg5: memref<1x64x32xf32, #tpu.memory_space<vmem>>, %arg6: memref<1x8x32xf32, #tpu.memory_space<vmem>>) attributes {dimension_semantics = [#tpu.dimension_semantics<parallel>, #tpu.dimension_semantics<parallel>], iteration_bounds = array<i64: 4, 1>, scalar_prefetch = 0 : i64, scratch_operands = 0 : i64, tpu.core_type = #tpu.core_type<tc>, window_params = [{transform_indices = @transform_0, window_bounds = array<i64: 1, 8, 32>}, {transform_indices = @transform_1, window_bounds = array<i64: 1, 32, 64>}, {transform_indices = @transform_2, window_bounds = array<i64: 1, 32, 64>}, {transform_indices = @transform_3, window_bounds = array<i64: 1, 64, 32>}, {transform_indices = @transform_4, window_bounds = array<i64: 1, 8, 32>}]} {
    %c0 = arith.constant 0 : index
    %c0_0 = arith.constant 0 : index
    %c0_1 = arith.constant 0 : index
    %0 = vector.load %arg2[%c0, %c0_0, %c0_1] : memref<1x8x32xf32, #tpu.memory_space<vmem>>, vector<1x8x32xf32>
    %1 = vector.shape_cast %0 : vector<1x8x32xf32> to vector<8x32xf32>
    %c0_2 = arith.constant 0 : index
    %c0_3 = arith.constant 0 : index
    %c0_4 = arith.constant 0 : index
    %2 = vector.load %arg3[%c0_2, %c0_3, %c0_4] : memref<1x32x64xf32, #tpu.memory_space<vmem>>, vector<1x32x64xf32>
    %3 = vector.shape_cast %2 : vector<1x32x64xf32> to vector<32x64xf32>
    %cst = arith.constant dense<0.000000e+00> : vector<8x64xf32>
    %4 = tpu.matmul %1, %3, %cst {dimension_numbers = #tpu.dot_dimension_numbers<[1], [0], [0], [1], [0, 0, 1, 1], [], []>} : vector<8x32xf32>, vector<32x64xf32>, vector<8x64xf32> -> vector<8x64xf32>
    %c0_5 = arith.constant 0 : index
    %c0_6 = arith.constant 0 : index
    %c0_7 = arith.constant 0 : index
    %5 = vector.load %arg4[%c0_5, %c0_6, %c0_7] : memref<1x32x64xf32, #tpu.memory_space<vmem>>, vector<1x32x64xf32>
    %6 = vector.shape_cast %5 : vector<1x32x64xf32> to vector<32x64xf32>
    %cst_8 = arith.constant dense<0.000000e+00> : vector<8x64xf32>
    %7 = tpu.matmul %1, %6, %cst_8 {dimension_numbers = #tpu.dot_dimension_numbers<[1], [0], [0], [1], [0, 0, 1, 1], [], []>} : vector<8x32xf32>, vector<32x64xf32>, vector<8x64xf32> -> vector<8x64xf32>
    %8 = arith.negf %4 : vector<8x64xf32>
    %9 = math.exp %8 : vector<8x64xf32>
    %cst_9 = arith.constant 1.000000e+00 : f32
    %10 = vector.broadcast %cst_9 : f32 to vector<8x64xf32>
    %11 = arith.addf %10, %9 : vector<8x64xf32>
    %12 = arith.divf %10, %11 : vector<8x64xf32>
    %13 = arith.mulf %4, %12 : vector<8x64xf32>
    %14 = arith.mulf %13, %7 : vector<8x64xf32>
    %c0_10 = arith.constant 0 : index
    %c0_11 = arith.constant 0 : index
    %c0_12 = arith.constant 0 : index
    %15 = vector.load %arg5[%c0_10, %c0_11, %c0_12] : memref<1x64x32xf32, #tpu.memory_space<vmem>>, vector<1x64x32xf32>
    %16 = vector.shape_cast %15 : vector<1x64x32xf32> to vector<64x32xf32>
    %cst_13 = arith.constant dense<0.000000e+00> : vector<8x32xf32>
    %17 = tpu.matmul %14, %16, %cst_13 {dimension_numbers = #tpu.dot_dimension_numbers<[1], [0], [0], [1], [0, 0, 1, 1], [], []>} : vector<8x64xf32>, vector<64x32xf32>, vector<8x32xf32> -> vector<8x32xf32>
    %c0_14 = arith.constant 0 : index
    %c0_15 = arith.constant 0 : index
    %c0_16 = arith.constant 0 : index
    %18 = vector.load %arg6[%c0_14, %c0_15, %c0_16] : memref<1x8x32xf32, #tpu.memory_space<vmem>>, vector<1x8x32xf32>
    %19 = vector.shape_cast %18 : vector<1x8x32xf32> to vector<8x32xf32>
    %20 = vector.shape_cast %17 : vector<8x32xf32> to vector<1x8x32xf32>
    tpu.vector_store %arg6[%c0_14, %c0_15, %c0_16], %20 {strides = array<i32>} : memref<1x8x32xf32, #tpu.memory_space<vmem>>, vector<1x8x32xf32>,
    return
  }
  func.func @transform_0(%arg0: i32, %arg1: i32) -> (i32, i32, i32) {
    %c0_i32 = arith.constant 0 : i32
    %c0_i32_0 = arith.constant 0 : i32
    return %arg0, %arg1, %c0_i32 : i32, i32, i32
  }
  func.func @transform_1(%arg0: i32, %arg1: i32) -> (i32, i32, i32) {
    %c0_i32 = arith.constant 0 : i32
    %c0_i32_0 = arith.constant 0 : i32
    %c0_i32_1 = arith.constant 0 : i32
    return %arg0, %c0_i32, %c0_i32_0 : i32, i32, i32
  }
  func.func @transform_2(%arg0: i32, %arg1: i32) -> (i32, i32, i32) {
    %c0_i32 = arith.constant 0 : i32
    %c0_i32_0 = arith.constant 0 : i32
    %c0_i32_1 = arith.constant 0 : i32
    return %arg0, %c0_i32, %c0_i32_0 : i32, i32, i32
  }
  func.func @transform_3(%arg0: i32, %arg1: i32) -> (i32, i32, i32) {
    %c0_i32 = arith.constant 0 : i32
    %c0_i32_0 = arith.constant 0 : i32
    %c0_i32_1 = arith.constant 0 : i32
    return %arg0, %c0_i32, %c0_i32_0 : i32, i32, i32
  }
  func.func @transform_4(%arg0: i32, %arg1: i32) -> (i32, i32, i32) {
    %c0_i32 = arith.constant 0 : i32
    %c0_i32_0 = arith.constant 0 : i32
    return %arg0, %arg1, %c0_i32 : i32, i32, i32
  }
}

</mosaic_0001>

<bundles_post_ra>
// kernel: tpu_custom_call.1
= control target key start
LH: loop header
LB: loop body
LE: loop exit
PB: predicated region body
PF: predicated region fallthrough
CT: control target
= control target key end

     0   :  { %9 = vsyncpa [#allocation3], 0  ;;  %s1055_s0 = inlined_call_operand.vmem [shape: f32[4,8,32], index: 0, kind: input, shape index: {}]   ;;  %s1056_s1 = inlined_call_operand.vmem [shape: f32[4,32,64], index: 1, kind: input, shape index: {}]   ;;  %s1057_s2 = inlined_call_operand.vmem [shape: f32[4,32,64], index: 2, kind: input, shape index: {}]   ;;  %s1058_s3 = inlined_call_operand.vmem [shape: f32[4,64,32], index: 3, kind: input, shape index: {}]   ;;  %s1059_s4 = inlined_call_operand.hbm [shape: f32[4,8,32], index: 4, kind: output, shape index: {}]  }
   0x1   :  { %11 = vsyncpa [#allocation3 + $0x1], 0  ;;  %s923_s15 = smov 0   ;;  %s925_s16 = smov 0  }
   0x2   :  { %s927_s17 = smov 0   ;;  %s929_s18 = smov 0  }
   0x3   :  { %s931_s19 = smov 0   ;;  %s933_s20 = smov 0  }
   0x4 LB: > { %s644_s21 = sadd.s32 4294967295, %s892_s20   ;;  %s645_s22 = sadd.s32 4294967294, %s892_s20   ;;  %s892_s20 = sphi %s933_s20, %s17_s20   ;;  %s888_s19 = sphi %s931_s19, %s1066_s19   ;;  %s884_s18 = sphi %s929_s18, %s1065_s18   ;;  %s880_s17 = sphi %s927_s17, %s1064_s17   ;;  %s876_s16 = sphi %s925_s16, %s1063_s16   ;;  %s872_s15 = sphi %s923_s15, %s1062_s15  }
   0x5   : > { %s29_s23 = sadd.s32 1, %s888_s19  ;;  %s144_s24 = sadd.s32 1, %s880_s17 }
   0x6   : > { %p31_p0 = scmp.ge.s32.totalorder %s29_s23, 4  ;;  %p154_p1 = scmp.ne.s32.totalorder %s880_s17, %s876_s16 }
   0x7   : > { %p155_p2 = scmp.eq.s32.totalorder %s644_s21, 3  ;;  %p160_p3 = scmp.ne.s32.totalorder %s876_s16, %s872_s15 }
   0x8   : > { %s1068_s23 = smov (%p31_p0, %s29_s23), 0  ;;  %p161_p5 = scmp.eq.s32.totalorder %s645_s22, 3 }
   0x9   : > { %p963_p4 = por %p155_p2, %p154_p1  ;;  %s139_s26 = ssub.s32 %s888_s19, %s1068_s23 }
   0xa   : > { %p648_p6 = scmp.ge.s32.totalorder %s892_s20, 1  ;;  %p142_p7 = scmp.eq.s32.totalorder %s139_s26, 0 }
   0xb   : > { %p970_p8 = por %p161_p5, %p160_p3  ;;  %p213_p9 = scmp.lt.s32.totalorder %s892_s20, 5 }
   0xc   : > { %s976_s28 = scalar_select %p142_p7, %s880_s17, %s144_s24  }
   0xd   : > { %p214_p10 = pnand %p648_p6, %p213_p9 }
   0xe   : > { %p256_p11 = scmp.lt.s32.totalorder (!%p214_p10), %s884_s18, 3  ;;  %v894_v0 = vmov (!%p214_p10), 0.0|0.0   ;;  %vm895_vm0 = vmmov (!%p214_p10), 0   ;;  %v896_v1 = vmov (!%p214_p10), 0.0   ;;  %vm283_vm1 = vcmask (!%p214_p10), 261120   ;;  %s662_s5 = sshll.u32 (!%p214_p10), %s884_s18, 7 }
   0xf   : > { %217 = sbr.rel (%p214_p10) target bundleno = 504 (0x1f8), region = 36  ;;  %728 = vmatprep.subr.bf16.mxu1 (!%p214_p10), %v894_v0  ;;  %695 = vmatprep.mubr.msk.f32.mxu1 (!%p214_p10), %vm895_vm0, %v896_v1  ;;  %vm447_vm2 = vcmask (!%p214_p10), 523264  }
  0x10   : > { %740 = vmatprep.subr.bf16.mxu0 (!%p214_p10), %v894_v0  ;;  %725 = vmatprep.mubr.msk.f32.mxu0 (!%p214_p10), %vm895_vm0, %v896_v1 }
  0x16   : > { %s981_s29 = scalar_select %p256_p11, %s884_s18, 3 }
  0x17   : > { %s897_s18 = smov [#allocation2]  }
  0x18   : > { %s665_s30 = sshll.u32 %s981_s29, 5  ;;  %s650_s11 = sshll.u32 %s981_s29, 3 }
  0x19   : > { %s267_s7 = scalar_lea.vmem %s1056_s1, %s665_s30  ;;  %s272_s10 = scalar_lea.vmem %s1057_s2, %s665_s30 }
  0x1a   : > { %v279_v2 = vld [vmem:[%s267_s7] sm:$0xff]  ;;  %v280_v3 = vld [vmem:[%s267_s7 + $0x8] sm:$0xff]  ;;  %v281_v4 = vld [vmem:[%s267_s7 + $0x10] sm:$0xff]  ;;  %s262_s14 = scalar_lea.vmem %s1055_s0, %s650_s11  ;;  %s667_s21 = sshll.u32 %s981_s29, 6 }
  0x1b   : > { %v729_v5 = vpack.c.bf16 %v280_v3, %v279_v2  ;;  %v282_v6 = vld [vmem:[%s267_s7 + $0x18] sm:$0xff]  ;;  %v357_v8 = vld [vmem:[%s272_s10] sm:$0xff]  ;;  %v358_v9 = vld [vmem:[%s272_s10 + $0x8] sm:$0xff]  ;;  %s277_s26 = scalar_lea.vmem %s1058_s3, %s667_s21  ;;  %s253_s29 = sand.u32 1, %s876_s16  }
  0x1c   : > { %v732_v7 = vpack.c.bf16 %v282_v6, %v281_v4  ;;  %v278_v10 = vld [vmem:[%s262_s14] sm:$0xff]  ;;  %v735_v11 = vpack.c.bf16 %v358_v9, %v357_v8  ;;  %v359_v12 = vld [vmem:[%s272_s10 + $0x10] sm:$0xff]  ;;  %v360_v13 = vld [vmem:[%s272_s10 + $0x18] sm:$0xff]  ;;  %s649_s30 = sshll.u32 %s253_s29, 3  ;;  %s1007_s10 = scalar_lea.hbm %s1059_s4, %s662_s5 }
  0x1d   : > { %730 = vmatpush3.bf16.msra.mxu1 %v729_v5  ;;  %v738_v14 = vpack.c.bf16 %v360_v13, %v359_v12  ;;  %v439_v15 = vld [vmem:[%s277_s26] sm:$0xff]  ;;  %v440_v16 = vld [vmem:[%s277_s26 + $0x8] sm:$0xff]  ;;  %v441_v18 = vld [vmem:[%s277_s26 + $0x10] sm:$0xff]  ;;  %s255_s6 = scalar_lea.vmem [#allocation2], %s649_s30  ;;  %s523_s11 = scalar_lea.sflag [#allocation3], %s253_s29 }
  0x1e   : > { %731 = vmatprep.subr.bf16.mxu1 %v894_v0  ;;  %v741_v17 = vpack.c.bf16 %v440_v16, %v439_v15  ;;  %v442_v19 = vld [vmem:[%s277_s26 + $0x18] sm:$0xff]  ;;  %v443_v21 = vld [vmem:[%s277_s26 + $0x20] sm:$0xff]  ;;  %v444_v22 = vld [vmem:[%s277_s26 + $0x28] sm:$0xff]  ;;  %s537_s7 = sshll.u32 %s255_s6, 4  ;;  %s818_s13 = sshll.u32 %s897_s18, 4  ;;  %s1009_s7 = int_to_ptr.vmem [resolvable:$true] %s537_s7  ;;  %s819_s13 = int_to_ptr.vmem [resolvable:$false] %s818_s13 }
  0x1f   : > { %v744_v20 = vpack.c.bf16 %v442_v19, %v441_v18  ;;  %v747_v23 = vpack.c.bf16 %v444_v22, %v443_v21  ;;  %v445_v24 = vld [vmem:[%s277_s26 + $0x30] sm:$0xff]  ;;  %v446_v25 = vld [vmem:[%s277_s26 + $0x38] sm:$0xff]  ;;  %s814_s12 = scalar_lea.vmem %s1009_s7, 128  ;;  %s820_s14 = scalar_lea.vmem %s819_s13, 256 }
  0x20   : > { %742 = vmatpush3.bf16.msra.mxu0 %v741_v17  ;;  %v750_v26 = vpack.c.bf16 %v446_v25, %v445_v24  ;;  %p815_p12 = scmp.ne.s32.totalorder %s1009_s7, %s814_s12  ;;  %p821_p1 = scmp.lt.s32.totalorder %s1009_s7, %s819_s13 }
  0x21   : > { %733 = vmatpush3.bf16.msra.mxu1 %v732_v7  ;;  %743 = vmatprep.subr.bf16.mxu0 %v894_v0  ;;  %p822_p2 = scmp.lt.s32.totalorder %s820_s14, %s814_s12 }
  0x22   : > { %734 = vmatprep.subr.bf16.mxu1 %v894_v0  ;;  %p816_p13 = pnand %p815_p12, %p963_p4 }
  0x23   : > { %p823_p3 = por %p822_p2, %p821_p1 }
  0x24   : > { %696 = vmatmul.mubr.msk.f32.vlgmr.msra.gmra.mrb[0].mxu1 %vm283_vm1, %v278_v10  ;;  %745 = vmatpush3.bf16.msra.mxu0 %v744_v20  ;;  %p817_p0 = pneg %p816_p13 }
  0x25   : > { %736 = vmatpush3.bf16.msra.mxu1 %v735_v11  ;;  %706 = vmatprep.mubr.msk.f32.mxu1 %vm895_vm0, %v896_v1 }
  0x26   : > { %737 = vmatprep.subr.bf16.mxu1 %v894_v0  ;;  %746 = vmatprep.subr.bf16.mxu0 %v894_v0  ;;  %p824_p5 = pnand %p823_p3, %p817_p0 }
  0x28   : > { %748 = vmatpush3.bf16.msra.mxu0 %v747_v23 }
  0x29   : > { %739 = vmatpush3.bf16.msra.mxu1 %v738_v14  ;;  %749 = vmatprep.subr.bf16.mxu0 %v894_v0 }
  0x2c   : > { %707 = vmatmul.mubr.msk.f32.vlgmr.msra.gmra.mrb[2].mxu1 %vm283_vm1, %v278_v10  ;;  %751 = vmatpush3.bf16.msra.mxu0 %v750_v26 }
  0xf7   : > { %v353_v27 = vpop.f32.mrb[0].mxu1 }
  0xf8   : > { %v659_v28 = vmul.f32 -1.442695, %v353_v27  ;;  %v697_v29 = vpop.f32.mrb[1].mxu1 }
  0xfa   : > { %810 = vpow2.f32 %v659_v28 }
  0xff   : > { %v427_v30 = vpop.f32.mrb[2].mxu1 }
 0x100   : > { %v708_v31 = vpop.f32.mrb[3].mxu1 }
 0x104   : > { %v811_v32 = vpop.eup %810 }
 0x105   : > { %v434_v33 = vadd.f32 1.0, %v811_v32 }
 0x107   : > { %812 = vrcp.f32 %v434_v33 }
 0x111   : > { %v813_v34 = vpop.eup %812 }
 0x112   : > { %v437_v35 = vmul.f32 %v813_v34, %v353_v27 }
 0x114   : > { %v438_v36 = vmul.f32 %v437_v35, %v427_v30 }
 0x116   : > { %726 = vmatmul.mubr.msk.f32.vlgmr.msra.gmra.mrb[0].mxu0 %vm447_vm2, %v438_v36 }
 0x1e9   : > { %v517_v37 = vpop.f32.mrb[0].mxu0 }
 0x1ea   : > { %521 = vst.msk [vmem:[%s255_s6] sm:$0xff] %vm283_vm1, %v517_v37  ;;  %v727_v38 = vpop.f32.mrb[1].mxu0 }
 0x1eb   : > { %827 = shalt.err (!%p824_p5)
}
 0x1ec   : > { %s828_s21 = scalar_lea.hbm %s1007_s10, 128  ;;  %s832_s26 = scalar_lea.hbm %s1059_s4, 512 }
 0x1ed   : > { %p829_p6 = scmp.ne.s32.totalorder %s1007_s10, %s828_s21  ;;  %p833_p10 = scmp.lt.u32.totalorder %s1007_s10, %s1059_s4 }
 0x1ee   : > { %p834_p11 = scmp.lt.u32.totalorder %s832_s26, %s828_s21  ;;  %p836_p13 = scmp.lt.u32.totalorder %s828_s21, %s1007_s10 }
 0x1ef   : > { %p830_p7 = pnand %p829_p6, %p963_p4 }
 0x1f0   : > { %p835_p12 = por %p834_p11, %p833_p10 }
 0x1f1   : > { %p831_p9 = pneg %p830_p7 }
 0x1f2   : > { %p837_p0 = por %p836_p13, %p835_p12 }
 0x1f4   : > { %p838_p1 = pnand %p837_p0, %p831_p9 }
 0x1f6   : > { %841 = shalt.err (!%p838_p1)
}
 0x1f7   : > { %752 = dma.vmem_to_hbm [thread:$0]  (%p963_p4), %s1009_s7, 128, %s1007_s10, %s523_s11  }
 0x1f8 PF: > { %p758_p2 = scmp.ge.s32.totalorder %s892_s20, 2  ;;  %s549_s5 = sand.u32 1, %s872_s15  }
 0x1f9   : > { %s550_s6 = scalar_lea.sflag [#allocation3], %s549_s5 }
 0x1fa   : > { %p755_p3 = pnand %p758_p2, %p970_p8 }
 0x1fc   : > { %867 = dma.done.wait (!%p755_p3), %s550_s6, 128  }
 0x1fd   : > { %869 = vsyncadd (!%p755_p3), %s550_s6, 4294967168  ;;  %s17_s20 = sadd.s32 1, %s892_s20   ;;  %s1062_s15 = smov %s876_s16 }
 0x1fe   : > { %p14_p5 = scmp.ge.s32.totalorder %s17_s20, 6   ;;  %s1063_s16 = smov %s880_s17 }
 0x1ff   : > { %s1064_s17 = smov %s976_s28  ;;  %s1065_s18 = smov %s888_s19 }
 0x200   : > { %s1066_s19 = smov %s1068_s23  ;;  %16 = sbr.rel (!%p14_p5) target bundleno = 4 (0x4), region = 80 }
 0x207   :  { %555 = vsyncpa [#allocation3], 1 }
 0x208   :  { %557 = vsyncpa [#allocation3 + $0x1], 1 }

</bundles_post_ra>
